<compile_context>
chip_gen: v5e
topology: v5e:2x2
jax: 0.10.0
libtpu: 0.0.40
codegen_flags: <defaults>
</compile_context>

<pallas_src>
import jax
import jax.numpy as jnp
from jax import lax
from jax.experimental import pallas as pl
from jax.experimental.pallas import tpu as pltpu


def policy_head_kernel(featT_ref, wT_ref, b_ref, vf_ref, act_ref):
    """featT: (H, TB), wT: (A+1, H), b: (A+1, 1) -> vf: (2, TB), act: (1, TB)."""
    # Single fused MXU op: rows 0..A-1 are the actor logits, row A is the critic value.
    out = jnp.dot(wT_ref[...], featT_ref[...],
                  preferred_element_type=jnp.float32) + b_ref[...]      # (A+1, TB)

    n_act = wT_ref.shape[0] - 1
    logits = out[:n_act, :]                                             # (A, TB)
    value = out[n_act:, :]                                              # (1, TB)

    # Online-stable logsumexp over the (small) action axis (sublane reduction).
    m = jnp.max(logits, axis=0, keepdims=True)                          # (1, TB)
    lse = jnp.log(jnp.sum(jnp.exp(logits - m), axis=0, keepdims=True))  # (1, TB)

    # deterministic action = first argmax (matches torch.argmax / jnp.argmax).
    row = lax.broadcasted_iota(jnp.int32, logits.shape, 0)              # (A, TB)
    cand = jnp.where(logits == m, row, n_act)                           # non-max -> sentinel
    action = jnp.min(cand, axis=0, keepdims=True)                       # (1, TB) i32

    # At the argmax row, logits - m == 0, so log_softmax there is exactly -lse.
    vf_ref[...] = jnp.concatenate([value, -lse], axis=0)                # (2, TB) lane-dense
    act_ref[...] = action                                               # (1, TB) lane-dense


def policy_act_head(features, wa, ba, wc, bc, *, batch_tile=128):
    """PolicyNonOracle.act() head with deterministic=True.

    features: (B, H) f32 backbone output
    wa: (H, A)  actor weight (transposed vs. torch's (A, H)),  ba: (1, A)
    wc: (H, 1)  critic weight,                                 bc: (1, 1)
    Returns (value (B,1) f32, action (B,1) i32, action_log_probs (B,1) f32).
    """
    B, H = features.shape
    A = wa.shape[1]

    # Fuse actor + critic into one weight/bias; transpose so batch is on the lane axis.
    w_t = jnp.concatenate([wa, wc], axis=1).T            # (A+1, H)
    b_col = jnp.concatenate([ba, bc], axis=1).T          # (A+1, 1)
    feat_t = features.T                                  # (H, B)

    tb = min(batch_tile, B)                              # tb == B (full dim) or a x128 tile
    grid = (pl.cdiv(B, tb),)

    vf, act = pl.pallas_call(
        policy_head_kernel,
        out_shape=(
            jax.ShapeDtypeStruct((2, B), jnp.float32),   # row 0: value, row 1: log-prob
            jax.ShapeDtypeStruct((1, B), jnp.int32),     # action
        ),
        grid_spec=pltpu.PrefetchScalarGridSpec(
            num_scalar_prefetch=0,
            grid=grid,
            in_specs=[
                pl.BlockSpec((H, tb), lambda i: (0, i)),      # features.T batch tile
                pl.BlockSpec((A + 1, H), lambda i: (0, 0)),   # fused weights (resident)
                pl.BlockSpec((A + 1, 1), lambda i: (0, 0)),   # fused bias (resident)
            ],
            out_specs=[
                pl.BlockSpec((2, tb), lambda i: (0, i)),
                pl.BlockSpec((1, tb), lambda i: (0, i)),
            ],
        ),
        compiler_params=pltpu.CompilerParams(
            dimension_semantics=("parallel",),           # batch tiles shard across TCs (v7x)
        ),
    )(feat_t, w_t, b_col)

    value = vf[0].reshape(B, 1)
    action_log_probs = vf[1].reshape(B, 1)
    action = act.reshape(B, 1)
    return value, action, action_log_probs


def _orthogonal(key, rows, cols, gain=1.0):
    # Deterministic orthogonal init (emulates nn.init.orthogonal_).
    a = jax.random.normal(key, (max(rows, cols), min(rows, cols)), dtype=jnp.float32)
    q, r = jnp.linalg.qr(a)
    q = q * jnp.sign(jnp.diagonal(r))
    if rows < cols:
        q = q.T
    return gain * q[:rows, :cols]


if __name__ == "__main__":
    # B = num_envs (batch), H = net.output_size, A = dim_actions.
    B, H, A = 256, 32, 4
    key = jax.random.PRNGKey(0)
    k_feat, k_wa, k_wc = jax.random.split(key, 3)

    features = jax.random.normal(k_feat, (B, H), dtype=jnp.float32)

    # CategoricalNet: Linear(H, A), orthogonal gain=0.01, bias 0.
    wa_pt = _orthogonal(k_wa, A, H, gain=0.01)        # PyTorch layout (out, in)
    wa = wa_pt.T                                      # kernel layout (H, A)
    ba = jnp.zeros((1, A), dtype=jnp.float32)

    # CriticHead: Linear(H, 1), orthogonal, bias 0.
    wc_pt = _orthogonal(k_wc, 1, H)                   # (1, H)
    wc = wc_pt.T                                      # (H, 1)
    bc = jnp.zeros((1, 1), dtype=jnp.float32)

    value, action, action_log_probs = policy_act_head(features, wa, ba, wc, bc)
    jax.block_until_ready((value, action, action_log_probs))

    # Pure-JAX reference check.
    logits_ref = features @ wa + ba
    value_ref = features @ wc + bc
    logp_ref = jax.nn.log_softmax(logits_ref, axis=-1)
    action_ref = jnp.argmax(logits_ref, axis=-1).astype(jnp.int32)[:, None]
    alp_ref = jnp.take_along_axis(logp_ref, action_ref, axis=-1)

    assert value.shape == (B, 1) and action.shape == (B, 1) and action_log_probs.shape == (B, 1)
    assert jnp.allclose(value, value_ref, atol=1e-5), "value mismatch"
    assert jnp.array_equal(action, action_ref), "action mismatch"
    assert jnp.allclose(action_log_probs, alp_ref, atol=1e-5), "log_prob mismatch"

    print("KERNEL_OK")
</pallas_src>

<mosaic_0001>
module attributes {stable_mosaic.version = 11 : i64} {
  func.func @policy_head_kernel(%arg0: i32, %arg1: memref<32x128xf32, #tpu.memory_space<vmem>>, %arg2: memref<5x32xf32, #tpu.memory_space<vmem>>, %arg3: memref<5x1xf32, #tpu.memory_space<vmem>>, %arg4: memref<2x128xf32, #tpu.memory_space<vmem>>, %arg5: memref<1x128xi32, #tpu.memory_space<vmem>>) attributes {dimension_semantics = [#tpu.dimension_semantics<parallel>], iteration_bounds = array<i64: 2>, scalar_prefetch = 0 : i64, scratch_operands = 0 : i64, tpu.core_type = #tpu.core_type<tc>, window_params = [{transform_indices = @transform_0, window_bounds = array<i64: 32, 128>}, {pipeline_mode = #tpu.pipeline_mode<synchronous>, transform_indices = @transform_1, window_bounds = array<i64: 5, 32>}, {pipeline_mode = #tpu.pipeline_mode<synchronous>, transform_indices = @transform_2, window_bounds = array<i64: 5, 1>}, {transform_indices = @transform_3, window_bounds = array<i64: 2, 128>}, {transform_indices = @transform_4, window_bounds = array<i64: 1, 128>}]} {
    %c0 = arith.constant 0 : index
    %c0_0 = arith.constant 0 : index
    %0 = vector.load %arg2[%c0, %c0_0] : memref<5x32xf32, #tpu.memory_space<vmem>>, vector<5x32xf32>
    %c0_1 = arith.constant 0 : index
    %c0_2 = arith.constant 0 : index
    %1 = vector.load %arg1[%c0_1, %c0_2] : memref<32x128xf32, #tpu.memory_space<vmem>>, vector<32x128xf32>
    %cst = arith.constant dense<0.000000e+00> : vector<5x128xf32>
    %2 = tpu.matmul %0, %1, %cst {dimension_numbers = #tpu.dot_dimension_numbers<[1], [0], [0], [1], [0, 0, 1, 1], [], []>} : vector<5x32xf32>, vector<32x128xf32>, vector<5x128xf32> -> vector<5x128xf32>
    %c0_3 = arith.constant 0 : index
    %c0_4 = arith.constant 0 : index
    %3 = vector.load %arg3[%c0_3, %c0_4] : memref<5x1xf32, #tpu.memory_space<vmem>>, vector<5x1xf32>
    %4 = vector.broadcast %3 : vector<5x1xf32> to vector<5x128xf32>
    %5 = arith.addf %2, %4 : vector<5x128xf32>
    %6 = vector.extract_strided_slice %5 {offsets = [0, 0], sizes = [4, 128], strides = [1, 1]} : vector<5x128xf32> to vector<4x128xf32>
    %7 = vector.extract_strided_slice %5 {offsets = [4, 0], sizes = [1, 128], strides = [1, 1]} : vector<5x128xf32> to vector<1x128xf32>
    %cst_5 = arith.constant dense<0xFF800000> : vector<128xf32>
    %8 = vector.multi_reduction <maximumf>, %6, %cst_5 [0] : vector<4x128xf32> to vector<128xf32>
    %9 = vector.shape_cast %8 : vector<128xf32> to vector<1x128xf32>
    %10 = vector.broadcast %9 : vector<1x128xf32> to vector<4x128xf32>
    %11 = arith.subf %6, %10 : vector<4x128xf32>
    %12 = math.exp %11 : vector<4x128xf32>
    %cst_6 = arith.constant dense<0.000000e+00> : vector<128xf32>
    %13 = vector.multi_reduction <add>, %12, %cst_6 [0] : vector<4x128xf32> to vector<128xf32>
    %14 = vector.shape_cast %13 : vector<128xf32> to vector<1x128xf32>
    %15 = math.log %14 : vector<1x128xf32>
    %16 = tpu.iota {dimensions = array<i32: 0>} : vector<4x128xi32>
    %17 = vector.broadcast %9 : vector<1x128xf32> to vector<4x128xf32>
    %18 = arith.cmpf oeq, %6, %17 : vector<4x128xf32>
    %c4_i32 = arith.constant 4 : i32
    %19 = vector.broadcast %c4_i32 : i32 to vector<4x128xi32>
    %20 = arith.select %18, %16, %19 : vector<4x128xi1>, vector<4x128xi32>
    %cst_7 = arith.constant dense<2147483647> : vector<128xi32>
    %21 = vector.multi_reduction <minsi>, %20, %cst_7 [0] : vector<4x128xi32> to vector<128xi32>
    %22 = vector.shape_cast %21 : vector<128xi32> to vector<1x128xi32>
    %cst_8 = arith.constant 0.000000e+00 : f32
    %23 = vector.broadcast %cst_8 : f32 to vector<1x128xf32>
    %24 = arith.subf %23, %15 : vector<1x128xf32>
    %25 = tpu.concatenate %7, %24 in 0 : vector<1x128xf32>, vector<1x128xf32> -> vector<2x128xf32>
    %c0_9 = arith.constant 0 : index
    %c0_10 = arith.constant 0 : index
    %26 = vector.load %arg4[%c0_9, %c0_10] : memref<2x128xf32, #tpu.memory_space<vmem>>, vector<2x128xf32>
    tpu.vector_store %arg4[%c0_9, %c0_10], %25 {strides = array<i32>} : memref<2x128xf32, #tpu.memory_space<vmem>>, vector<2x128xf32>,
    %c0_11 = arith.constant 0 : index
    %c0_12 = arith.constant 0 : index
    %27 = vector.load %arg5[%c0_11, %c0_12] : memref<1x128xi32, #tpu.memory_space<vmem>>, vector<1x128xi32>
    tpu.vector_store %arg5[%c0_11, %c0_12], %22 {strides = array<i32>} : memref<1x128xi32, #tpu.memory_space<vmem>>, vector<1x128xi32>,
    return
  }
  func.func @transform_0(%arg0: i32) -> (i32, i32) {
    %c0_i32 = arith.constant 0 : i32
    %c0_i32_0 = arith.constant 0 : i32
    return %c0_i32, %arg0 : i32, i32
  }
  func.func @transform_1(%arg0: i32) -> (i32, i32) {
    %c0_i32 = arith.constant 0 : i32
    %c0_i32_0 = arith.constant 0 : i32
    %c0_i32_1 = arith.constant 0 : i32
    return %c0_i32, %c0_i32_0 : i32, i32
  }
  func.func @transform_2(%arg0: i32) -> (i32, i32) {
    %c0_i32 = arith.constant 0 : i32
    %c0_i32_0 = arith.constant 0 : i32
    %c0_i32_1 = arith.constant 0 : i32
    return %c0_i32, %c0_i32_0 : i32, i32
  }
  func.func @transform_3(%arg0: i32) -> (i32, i32) {
    %c0_i32 = arith.constant 0 : i32
    %c0_i32_0 = arith.constant 0 : i32
    return %c0_i32, %arg0 : i32, i32
  }
  func.func @transform_4(%arg0: i32) -> (i32, i32) {
    %c0_i32 = arith.constant 0 : i32
    %c0_i32_0 = arith.constant 0 : i32
    return %c0_i32, %arg0 : i32, i32
  }
}

</mosaic_0001>

<bundles_post_ra>
// kernel: tpu_custom_call.1
= control target key start
LH: loop header
LB: loop body
LE: loop exit
PB: predicated region body
PF: predicated region fallthrough
CT: control target
= control target key end

     0   :  { %10 = vsyncpa [#allocation3], 0  ;;  %s824_s0 = inlined_call_operand.hbm [shape: f32[32,256], index: 0, kind: input, shape index: {}]   ;;  %s825_s1 = inlined_call_operand.vmem [shape: f32[5,32], index: 1, kind: input, shape index: {}]   ;;  %s826_s2 = inlined_call_operand.vmem [shape: f32[5,1], index: 2, kind: input, shape index: {}]   ;;  %s827_s3 = inlined_call_operand.hbm [shape: f32[2,256], index: 3, kind: output, shape index: {0}]   ;;  %s828_s4 = inlined_call_operand.hbm [shape: s32[1,256], index: 4, kind: output, shape index: {1}]  }
   0x1   :  { %12 = vsyncpa [#allocation3 + $0x1], 0 }
   0x2   :  { %13 = vsyncpa [#allocation4], 0 }
   0x3   :  { %15 = vsyncpa [#allocation4 + $0x1], 0 }
   0x4   :  { %16 = vsyncpa [#allocation7], 0 }
   0x5   :  { %18 = vsyncpa [#allocation7 + $0x1], 0  ;;  %s667_s15 = smov 0   ;;  %s669_s16 = smov 0  }
   0x6   :  { %s671_s17 = smov 0   ;;  %s673_s18 = smov 0  }
   0x7 LB: > { %s688_s19 = sadd.s32 4294967295, %s636_s18   ;;  %s435_s20 = sadd.s32 4294967294, %s636_s18   ;;  %s636_s18 = sphi %s673_s18, %s837_s18   ;;  %s632_s17 = sphi %s671_s17, %s836_s17   ;;  %s628_s16 = sphi %s669_s16, %s835_s16   ;;  %s624_s15 = sphi %s667_s15, %s834_s15  }
   0x8   : > { %s692_s21 = sadd.s32 1, %s636_s18   ;;  %s31_s22 = sadd.s32 1, %s632_s17 }
   0x9   : > { %s28_s23 = ssub.s32 %s636_s18, %s692_s21  ;;  %p38_p0 = scmp.ne.s32.totalorder %s632_s17, %s628_s16 }
   0xa   : > { %p29_p1 = scmp.eq.s32.totalorder %s28_s23, 0  ;;  %p39_p2 = scmp.eq.s32.totalorder %s636_s18, 0 }
   0xb   : > { %p44_p3 = scmp.ne.s32.totalorder %s628_s16, %s624_s15  ;;  %p45_p4 = scmp.eq.s32.totalorder %s688_s19, 0 }
   0xc   : > { %s704_s24 = scalar_select %p29_p1, %s632_s17, %s31_s22  }
   0xd   : > { %p706_p5 = por %p39_p2, %p38_p0  ;;  %p710_p6 = por %p45_p4, %p44_p3 }
   0xe   : > { %p110_p7 = scmp.eq.s32.totalorder %s688_s19, 1  ;;  %p116_p8 = scmp.eq.s32.totalorder %s435_s20, 1 }
   0xf   : > { %p437_p9 = scmp.ge.s32.totalorder %s636_s18, 2  ;;  %p465_p10 = scmp.lt.s32.totalorder %s636_s18, 2 }
  0x10   : > { %p717_p11 = por %p110_p7, %p38_p0  ;;  %p721_p12 = por %p116_p8, %p44_p3 }
  0x11   : > { %s168_s29 = sand.u32 1, %s632_s17   ;;  %s439_s30 = sshll.u32 %s636_s18, 3 }
  0x12   : > { %s438_s5 = sshll.u32 %s168_s29, 5  ;;  %s176_s8 = scalar_lea.hbm %s824_s0, %s439_s30 }
  0x13   : > { %s177_s9 = sshll.u32 %s176_s8, 4  ;;  %s172_s10 = scalar_lea.vmem [#allocation2], %s438_s5  ;;  %s178_s9 = int_to_ptr.hbm [resolvable:$true] %s177_s9 }
  0x14   : > { %s179_s11 = sshll.u32 %s172_s10, 4  ;;  %p732_p13 = pnand %p465_p10, %p706_p5  ;;  %s180_s11 = int_to_ptr.vmem [resolvable:$true] %s179_s11 }
  0x15   : > { %p440_p0 = scmp.ge.s32.totalorder %s636_s18, 1  ;;  %s169_s13 = scalar_lea.sflag [#allocation3], %s168_s29 }
  0x16   : > { %s508_s14 = sshra.s32 %s178_s9, 4  ;;  %p512_p2 = pneg %p732_p13  ;;  %s509_s14 = int_to_ptr.hbm [resolvable:$true] %s508_s14 }
  0x17   : > { %s510_s20 = scalar_lea.hbm %s509_s14, 32  ;;  %s515_s30 = scalar_lea.hbm %s824_s0, 64 }
  0x18   : > { %p511_p1 = scmp.ne.s32.totalorder %s509_s14, %s510_s20  ;;  %p516_p5 = scmp.lt.s32.totalorder %s509_s14, %s824_s0 }
  0x19   : > { %p517_p7 = scmp.lt.s32.totalorder %s515_s30, %s510_s20 }
  0x1a   : > { %p513_p3 = pnand %p512_p2, %p511_p1 }
  0x1b   : > { %p518_p8 = por %p517_p7, %p516_p5 }
  0x1c   : > { %p514_p4 = pneg %p513_p3 }
  0x1e   : > { %p519_p10 = pnand %p518_p8, %p514_p4 }
  0x20   : > { %522 = shalt.err (!%p519_p10)
}
  0x21   : > { %s638_s29 = smov 256   ;;  %s639_s6 = smov 128  }
  0x22   : > { %s640_s7 = smov 8   ;;  %p187_p1 = scmp.lt.s32.totalorder %s636_s18, 3 }
  0x23   : > { %457 = dma.hbm_to_vmem [thread:$0]  (!%p732_p13), %s178_s9, 512, %s180_s11, %s169_s13, %s638_s29, %s639_s6, %s640_s7  }
  0x24   : > { %p188_p2 = pnand %p440_p0, %p187_p1 }
  0x25   : > { %s751_s8 = sand.u32 (!%p188_p2), 1, %s628_s16  }
  0x26   : > { %191 = sbr.rel (%p188_p2) target bundleno = 232 (0xe8), region = 32  ;;  %s441_s10 = sshll.u32 (!%p188_p2), %s751_s8, 5 }
  0x27   : > { %s194_s14 = scalar_lea.sflag (!%p188_p2), [#allocation3], %s751_s8  ;;  %s197_s20 = scalar_lea.vmem (!%p188_p2), [#allocation2], %s441_s10 }
  0x2b   : > { %611 = dma.done.wait (%p710_p6), %s194_s14, 512  }
  0x2c   : > { %613 = vsyncadd (%p710_p6), %s194_s14, 4294966784  ;;  %v641_v0 = vmov 0   ;;  %v231_v1 = vld [vmem:[%s197_s20 + $0x18] sm:$0xff]  ;;  %v230_v2 = vld [vmem:[%s197_s20 + $0x10] sm:$0xff]  ;;  %vm238_vm0 = vcmask 261120   ;;  %vm262_vm1 = vcmask 1043456   ;;  %v282_v14 = vlaneseq  ;;  %s332_s23 = scalar_lea.hbm %s828_s4, %s688_s19 }
  0x2d   : > { %503 = vset.pattern.permute.xlu0 %v641_v0  ;;  %254 = vmatpush.msra.mxu0 %v231_v1  ;;  %v232_v3 = vld [vmem:[%s826_s2] sm:$0x1f]  ;;  %v229_v4 = vld [vmem:[%s197_s20 + $0x8] sm:$0xff]  ;;  %s226_s30 = scalar_lea.vmem [#allocation6], %s751_s8  ;;  %s336_s5 = sshll.u32 %s332_s23, 4  ;;  %s337_s5 = int_to_ptr.hbm [resolvable:$true] %s336_s5 }
  0x2e   : > { %235 = vperm.xlu0 %503, %v232_v3   ;;  %v228_v5 = vld [vmem:[%s197_s20] sm:$0xff]  ;;  %v283_v17 = vshrl.u32 %v282_v14, 7  ;;  %s334_s25 = sshll.u32 %s226_s30, 4  ;;  %s310_s29 = scalar_lea.sflag [#allocation7], %s751_s8  ;;  %s335_s25 = int_to_ptr.vmem [resolvable:$true] %s334_s25 }
  0x2f   : > { %255 = vmatpush.msra.mxu0 %v230_v2  ;;  %v227_v6 = vld [vmem:[%s825_s1] sm:$0x1f]  ;;  %s552_s6 = sshra.s32 %s337_s5, 4  ;;  %s558_s20 = scalar_lea.hbm %s828_s4, 2  ;;  %s553_s6 = int_to_ptr.hbm [resolvable:$true] %s552_s6 }
  0x30   : > { %s554_s7 = scalar_lea.hbm %s553_s6, 1  ;;  %p559_p3 = scmp.lt.s32.totalorder %s553_s6, %s828_s4 }
  0x31   : > { %256 = vmatpush.msra.mxu0 %v229_v4  ;;  %p555_p6 = scmp.ne.s32.totalorder %s553_s6, %s554_s7  ;;  %p560_p4 = scmp.lt.s32.totalorder %s558_s20, %s554_s7 }
  0x33   : > { %257 = vmatpush.msra.mxu0 %v228_v5  ;;  %p556_p13 = pnand %p555_p6, %p717_p11  ;;  %p561_p5 = por %p560_p4, %p559_p3 }
  0x34   : > { %443 = vmatmul.msk.f32.vlgmr.msra.gmra.mxu0 %vm238_vm0, %v227_v6 }
  0x35   : > { %p557_p0 = pneg %p556_p13 }
  0x37   : > { %p562_p7 = pnand %p561_p5, %p557_p0 }
  0xa0   : > { %v236_v7 = vpop.permute.xlu0 %235 }
  0xb1   : > { %v259_v8 = vpop.f32.mrf.mxu0 }
  0xb2   : > { %v765_v9 = vadd.f32 %v259_v8, %v236_v7 }
  0xb4   : > { %v263_v10 = vsel %vm262_vm1, %v765_v9, -inf }
  0xb5   : > { %v264_v11 = vrot.slane %v263_v10, 4 }
  0xb7   : > { %v265_v12 = vmax.f32 %v263_v10, %v264_v11 }
  0xb9   : > { %v266_v13 = vrot.slane %v265_v12, 2 }
  0xbb   : > { %v267_v15 = vmax.f32 %v265_v12, %v266_v13 }
  0xbd   : > { %v268_v16 = vrot.slane %v267_v15, 1 }
  0xbf   : > { %v269_v18 = vmax.f32 %v267_v15, %v268_v16 }
  0xc1   : > { %v270_v19 = vsub.f32 %v765_v9, %v269_v18  ;;  %vm284_vm2 = vcmp.eq.f32.partialorder %v765_v9, %v269_v18 }
  0xc2   : > { %v285_v20 = vsel %vm284_vm2, %v283_v17, 4 }
  0xc3   : > { %v271_v21 = vmul.f32 1.442695, %v270_v19  ;;  %v286_v22 = vsel %vm262_vm1, %v285_v20, 2147483647 }
  0xc4   : > { %v287_v23 = vrot.slane %v286_v22, 4 }
  0xc5   : > { %504 = vpow2.f32 %v271_v21 }
  0xc6   : > { %vm288_vm3 = vcmp.lt.s32.totalorder %v286_v22, %v287_v23 }
  0xc7   : > { %v289_v24 = vsel %vm288_vm3, %v286_v22, %v287_v23 }
  0xc8   : > { %v290_v25 = vrot.slane %v289_v24, 2 }
  0xca   : > { %vm291_vm4 = vcmp.lt.s32.totalorder %v289_v24, %v290_v25 }
  0xcb   : > { %v505_v26 = vpop.eup %504  ;;  %v292_v27 = vsel %vm291_vm4, %v289_v24, %v290_v25 }
  0xcc   : > { %v273_v28 = vsel %vm262_vm1, %v505_v26, 0.0  ;;  %v293_v29 = vrot.slane %v292_v27, 1 }
  0xcd   : > { %v274_v30 = vrot.slane %v273_v28, 4 }
  0xce   : > { %vm294_vm5 = vcmp.lt.s32.totalorder %v292_v27, %v293_v29 }
  0xcf   : > { %v275_v31 = vadd.f32 %v274_v30, %v273_v28  ;;  %v295_v32 = vsel %vm294_vm5, %v292_v27, %v293_v29 }
  0xd0   : > { %303 = vst [vmem:[%s226_s30] sm:$0x1] %v295_v32 }
  0xd1   : > { %v276_v33 = vrot.slane %v275_v31, 2 }
  0xd2   : > { %565 = shalt.err (!%p562_p7)
}
  0xd3   : > { %451 = dma.vmem_to_hbm [thread:$0]  (%p717_p11), %s335_s25, 16, %s337_s5, %s310_s29   ;;  %v277_v34 = vadd.f32 %v276_v33, %v275_v31  ;;  %vm300_vm6 = vcmask 1040384   ;;  %v298_v39 = vrot.slane %v765_v9, 4 }
  0xd4   : > { %s442_s12 = sshll.u32 %s751_s8, 1  ;;  %s445_s13 = sshll.u32 %s688_s19, 1 }
  0xd5   : > { %v278_v35 = vrot.slane %v277_v34, 1  ;;  %s319_s23 = scalar_lea.hbm %s827_s3, %s445_s13  ;;  %s220_s30 = scalar_lea.vmem [#allocation5], %s442_s12 }
  0xd6   : > { %s321_s6 = sshll.u32 %s220_s30, 4  ;;  %s323_s7 = sshll.u32 %s319_s23, 4  ;;  %s322_s6 = int_to_ptr.vmem [resolvable:$true] %s321_s6  ;;  %s324_s7 = int_to_ptr.hbm [resolvable:$true] %s323_s7 }
  0xd7   : > { %v279_v36 = vadd.f32 %v278_v35, %v277_v34  ;;  %s305_s25 = scalar_lea.sflag [#allocation4], %s751_s8  ;;  %s580_s19 = sshra.s32 %s324_s7, 4  ;;  %s581_s19 = int_to_ptr.hbm [resolvable:$true] %s580_s19 }
  0xd8   : > { %s582_s5 = scalar_lea.hbm %s581_s19, 2  ;;  %s586_s14 = scalar_lea.hbm %s827_s3, 4 }
  0xd9   : > { %506 = vlog2.f32 %v279_v36  ;;  %p583_p8 = scmp.ne.s32.totalorder %s581_s19, %s582_s5  ;;  %p587_p2 = scmp.lt.s32.totalorder %s581_s19, %s827_s3 }
  0xda   : > { %p588_p6 = scmp.lt.s32.totalorder %s586_s14, %s582_s5 }
  0xdb   : > { %p584_p10 = pnand %p583_p8, %p717_p11 }
  0xdc   : > { %p589_p13 = por %p588_p6, %p587_p2 }
  0xdd   : > { %p585_p1 = pneg %p584_p10 }
  0xdf   : > { %v507_v37 = vpop.eup %506  ;;  %p590_p0 = pnand %p589_p13, %p585_p1 }
  0xe0   : > { %v281_v38 = vmul.f32 0.6931472, %v507_v37 }
  0xe2   : > { %v296_v40 = vsub.f32 0.0, %v281_v38 }
  0xe4   : > { %v301_v41 = vsel %vm300_vm6, %v298_v39, %v296_v40 }
  0xe5   : > { %302 = vst [vmem:[%s220_s30] sm:$0x3] %v301_v41 }
  0xe6   : > { %593 = shalt.err (!%p590_p0)
}
  0xe7   : > { %450 = dma.vmem_to_hbm [thread:$0]  (%p717_p11), %s322_s6, 32, %s324_s7, %s305_s25  }
  0xe8 PF: > { %s348_s8 = sand.u32 1, %s624_s15   ;;  %p459_p3 = pnand %p437_p9, %p721_p12 }
  0xe9   : > { %s349_s11 = scalar_lea.sflag [#allocation4], %s348_s8 }
  0xea   : > { %p460_p4 = pneg %p459_p3 }
  0xec   : > { %615 = dma.done.wait (%p460_p4), %s349_s11, 32  }
  0xed   : > { %617 = vsyncadd (%p460_p4), %s349_s11, 4294967264  ;;  %s359_s12 = scalar_lea.sflag [#allocation7], %s348_s8 }
  0xee   : > { %619 = dma.done.wait (%p460_p4), %s359_s12, 16  }
  0xef   : > { %621 = vsyncadd (%p460_p4), %s359_s12, 4294967280  ;;  %p21_p11 = scmp.ge.s32.totalorder %s692_s21, 4   ;;  %s834_s15 = smov %s628_s16 }
  0xf0   : > { %s835_s16 = smov %s632_s17  ;;  %s836_s17 = smov %s704_s24 }
  0xf1   : > { %s837_s18 = smov %s692_s21  ;;  %23 = sbr.rel (!%p21_p11) target bundleno = 7 (0x7), region = 94 }
  0xf6   :  { %364 = vsyncpa [#allocation3], 1 }
  0xf7   :  { %366 = vsyncpa [#allocation3 + $0x1], 1 }
  0xf8   :  { %367 = vsyncpa [#allocation4], 1 }
  0xf9   :  { %369 = vsyncpa [#allocation4 + $0x1], 1 }
  0xfa   :  { %370 = vsyncpa [#allocation7], 1 }
  0xfb   :  { %372 = vsyncpa [#allocation7 + $0x1], 1 }

</bundles_post_ra>
